<compile_context>
chip_gen: v5e
topology: v5e:2x2
jax: 0.10.0
libtpu: 0.0.40
codegen_flags: <defaults>
</compile_context>

<pallas_src>
import math

import jax
import jax.numpy as jnp
from jax.experimental import pallas as pl
from jax.experimental.pallas import tpu as pltpu


def _round_up(x, m):
    return ((x + m - 1) // m) * m


def _dual_linear_kernel(x_ref, wt_ref, o_ref, acc_ref):
    # x_ref:  (tm, tk) tile of padded input
    # wt_ref: (tk, tn) tile of padded W^T
    # o_ref:  (tm, tn) tile of padded output
    # acc_ref: (tm, tn) float32 accumulator, resident across the K axis
    k = pl.program_id(2)

    @pl.when(k == 0)
    def _():
        acc_ref[...] = jnp.zeros_like(acc_ref)

    acc_ref[...] += jnp.dot(
        x_ref[...], wt_ref[...], preferred_element_type=jnp.float32
    )

    @pl.when(k == pl.num_programs(2) - 1)
    def _():
        o_ref[...] = acc_ref[...].astype(o_ref.dtype)


def dual_linear_forward(
    x,
    forward_weight,
    feedback_weight=None,
    *,
    compute_dtype=None,   # e.g. jnp.bfloat16 on v6e/v7x when accuracy allows
    tm_max=256,
    tn_max=512,
    tk_max=512,
):
    """Pallas implementation of DualLinear.forward: x @ forward_weight.T.

    feedback_weight is accepted for interface parity but unused in forward
    (it only participates in the custom backward in PyTorch).
    """
    del feedback_weight  # forward pass never touches it
    M, K = x.shape
    N, K_w = forward_weight.shape
    assert K == K_w, "in_features mismatch between input and forward_weight"

    out_dtype = x.dtype
    if compute_dtype is None:
        compute_dtype = x.dtype

    # Pre-transpose the (reused) weight once in the wrapper so the kernel sees
    # the canonical [M,K] x [K,N] form (keeps XLU free of per-tile transposes).
    xc = x.astype(compute_dtype)
    wt = forward_weight.T.astype(compute_dtype)  # (K, N)

    # Tile sizes: sublane-aligned M tile; lane-dense (>=128-multiple) K/N tiles.
    tm = min(tm_max, _round_up(M, 8))
    tn = min(tn_max, _round_up(N, 128))
    tk = min(tk_max, _round_up(K, 128))

    Mp = _round_up(M, tm)
    Kp = _round_up(K, tk)
    Np = _round_up(N, tn)

    # Zero-padding along K adds zero contributions; M/N padding is sliced off.
    if (Mp, Kp) != (M, K):
        xc = jnp.pad(xc, ((0, Mp - M), (0, Kp - K)))
    if (Kp, Np) != (K, N):
        wt = jnp.pad(wt, ((0, Kp - K), (0, Np - N)))

    grid = (Mp // tm, Np // tn, Kp // tk)

    elt = jnp.dtype(compute_dtype).itemsize
    cost = pl.CostEstimate(
        flops=2 * Mp * Np * Kp,
        transcendentals=0,
        bytes_accessed=(Mp * Kp * elt
                        + Kp * Np * elt
                        + Mp * Np * jnp.dtype(out_dtype).itemsize),
    )

    out_padded = pl.pallas_call(
        _dual_linear_kernel,
        out_shape=jax.ShapeDtypeStruct((Mp, Np), out_dtype),
        grid=grid,
        in_specs=[
            pl.BlockSpec((tm, tk), lambda i, j, k: (i, k)),
            pl.BlockSpec((tk, tn), lambda i, j, k: (k, j)),
        ],
        out_specs=pl.BlockSpec((tm, tn), lambda i, j, k: (i, j)),
        scratch_shapes=[pltpu.VMEM((tm, tn), jnp.float32)],
        compiler_params=pltpu.CompilerParams(
            dimension_semantics=("parallel", "parallel", "arbitrary"),
            vmem_limit_bytes=64 * 1024 * 1024,
        ),
        cost_estimate=cost,
    )(xc, wt)

    if (Mp, Np) != (M, N):
        out_padded = out_padded[:M, :N]
    return out_padded


def init_dual_linear_params(key, input_features, output_features, dtype=jnp.float32):
    """Deterministic init matching nn.init.kaiming_uniform_(w, a=sqrt(5)).

    For a (out, in) weight with a=sqrt(5): gain = sqrt(2/(1+5)) = 1/sqrt(3),
    fan_in = in_features, bound = gain * sqrt(3/fan_in) = 1/sqrt(fan_in).
    """
    bound = 1.0 / math.sqrt(input_features)
    return jax.random.uniform(
        key, (output_features, input_features),
        minval=-bound, maxval=bound, dtype=dtype)


if __name__ == "__main__":
    key = jax.random.PRNGKey(0)
    k_x, k_fw, k_fb = jax.random.split(key, 3)

    batch = 8
    input_features = 32
    output_features = 16

    x = jax.random.normal(k_x, (batch, input_features), dtype=jnp.float32)
    forward_weight = init_dual_linear_params(k_fw, input_features, output_features)
    # feedback_weight has the same shape as forward_weight; unused in forward.
    feedback_weight = jax.random.normal(
        k_fb, (output_features, input_features), dtype=jnp.float32)

    out = dual_linear_forward(x, forward_weight, feedback_weight)
    out = jax.block_until_ready(out)

    # Correctness check against pure-JAX reference of input.mm(forward_weight.t()).
    ref = x @ forward_weight.T
    assert out.shape == (batch, output_features)
    assert jnp.allclose(out, ref, atol=1e-5, rtol=1e-5)

    print("KERNEL_OK")
</pallas_src>

<mosaic_0001>
module attributes {stable_mosaic.version = 11 : i64} {
  func.func @_dual_linear_kernel(%arg0: i32, %arg1: i32, %arg2: i32, %arg3: memref<8x128xf32, #tpu.memory_space<vmem>>, %arg4: memref<128x128xf32, #tpu.memory_space<vmem>>, %arg5: memref<8x128xf32, #tpu.memory_space<vmem>>, %arg6: memref<8x128xf32, #tpu.memory_space<vmem>>) attributes {dimension_semantics = [#tpu.dimension_semantics<parallel>, #tpu.dimension_semantics<parallel>, #tpu.dimension_semantics<arbitrary>], iteration_bounds = array<i64: 1, 1, 1>, scalar_prefetch = 0 : i64, scratch_operands = 1 : i64, tpu.core_type = #tpu.core_type<tc>, window_params = [{transform_indices = @transform_0, window_bounds = array<i64: 8, 128>}, {transform_indices = @transform_1, window_bounds = array<i64: 128, 128>}, {transform_indices = @transform_2, window_bounds = array<i64: 8, 128>}]} {
    %c0_i32 = arith.constant 0 : i32
    %0 = arith.cmpi eq, %arg2, %c0_i32 : i32
    %1 = arith.extui %0 : i1 to i32
    %c0_i32_0 = arith.constant 0 : i32
    %2 = arith.cmpi ne, %1, %c0_i32_0 : i32
    scf.if %2 {
      %cst_10 = arith.constant 0.000000e+00 : f32
      %12 = vector.broadcast %cst_10 : f32 to vector<8x128xf32>
      %c0_11 = arith.constant 0 : index
      %c0_12 = arith.constant 0 : index
      %13 = vector.load %arg6[%c0_11, %c0_12] : memref<8x128xf32, #tpu.memory_space<vmem>>, vector<8x128xf32>
      tpu.vector_store %arg6[%c0_11, %c0_12], %12 {strides = array<i32>} : memref<8x128xf32, #tpu.memory_space<vmem>>, vector<8x128xf32>,
    } else {
    }
    %c0 = arith.constant 0 : index
    %c0_1 = arith.constant 0 : index
    %3 = vector.load %arg6[%c0, %c0_1] : memref<8x128xf32, #tpu.memory_space<vmem>>, vector<8x128xf32>
    %c0_2 = arith.constant 0 : index
    %c0_3 = arith.constant 0 : index
    %4 = vector.load %arg3[%c0_2, %c0_3] : memref<8x128xf32, #tpu.memory_space<vmem>>, vector<8x128xf32>
    %c0_4 = arith.constant 0 : index
    %c0_5 = arith.constant 0 : index
    %5 = vector.load %arg4[%c0_4, %c0_5] : memref<128x128xf32, #tpu.memory_space<vmem>>, vector<128x128xf32>
    %cst = arith.constant dense<0.000000e+00> : vector<8x128xf32>
    %6 = tpu.matmul %4, %5, %cst {dimension_numbers = #tpu.dot_dimension_numbers<[1], [0], [0], [1], [0, 0, 1, 1], [], []>} : vector<8x128xf32>, vector<128x128xf32>, vector<8x128xf32> -> vector<8x128xf32>
    %7 = arith.addf %3, %6 : vector<8x128xf32>
    %c0_6 = arith.constant 0 : index
    %c0_7 = arith.constant 0 : index
    %8 = vector.load %arg6[%c0_6, %c0_7] : memref<8x128xf32, #tpu.memory_space<vmem>>, vector<8x128xf32>
    tpu.vector_store %arg6[%c0_6, %c0_7], %7 {strides = array<i32>} : memref<8x128xf32, #tpu.memory_space<vmem>>, vector<8x128xf32>,
    %c0_i32_8 = arith.constant 0 : i32
    %9 = arith.cmpi eq, %arg2, %c0_i32_8 : i32
    %10 = arith.extui %9 : i1 to i32
    %c0_i32_9 = arith.constant 0 : i32
    %11 = arith.cmpi ne, %10, %c0_i32_9 : i32
    scf.if %11 {
      %c0_10 = arith.constant 0 : index
      %c0_11 = arith.constant 0 : index
      %12 = vector.load %arg6[%c0_10, %c0_11] : memref<8x128xf32, #tpu.memory_space<vmem>>, vector<8x128xf32>
      %c0_12 = arith.constant 0 : index
      %c0_13 = arith.constant 0 : index
      %13 = vector.load %arg5[%c0_12, %c0_13] : memref<8x128xf32, #tpu.memory_space<vmem>>, vector<8x128xf32>
      tpu.vector_store %arg5[%c0_12, %c0_13], %12 {strides = array<i32>} : memref<8x128xf32, #tpu.memory_space<vmem>>, vector<8x128xf32>,
    } else {
    }
    return
  }
  func.func @transform_0(%arg0: i32, %arg1: i32, %arg2: i32) -> (i32, i32) {
    %c0_i32 = arith.constant 0 : i32
    return %arg0, %arg2 : i32, i32
  }
  func.func @transform_1(%arg0: i32, %arg1: i32, %arg2: i32) -> (i32, i32) {
    %c0_i32 = arith.constant 0 : i32
    return %arg2, %arg1 : i32, i32
  }
  func.func @transform_2(%arg0: i32, %arg1: i32, %arg2: i32) -> (i32, i32) {
    %c0_i32 = arith.constant 0 : i32
    return %arg0, %arg1 : i32, i32
  }
}

</mosaic_0001>

<bundles_post_ra>
// kernel: tpu_custom_call.1
= control target key start
LH: loop header
LB: loop body
LE: loop exit
PB: predicated region body
PF: predicated region fallthrough
CT: control target
= control target key end

     0   :  { %7 = vsyncpa [#allocation4], 0  ;;  %s222_s0 = inlined_call_operand.hbm [shape: f32[8,128], index: 0, kind: input, shape index: {}]   ;;  %s223_s1 = inlined_call_operand.hbm [shape: f32[128,128], index: 1, kind: input, shape index: {}]   ;;  %s224_s2 = inlined_call_operand.hbm [shape: f32[8,128], index: 2, kind: output, shape index: {}]  }
   0x1   :  { %8 = vsyncpa [#allocation7], 0 }
   0x2   :  { %9 = vsyncpa [#allocation5], 0  ;;  %s15_s11 = sshll.u32 %s222_s0, 4  ;;  %s193_s12 = smov [#allocation3]   ;;  %s16_s11 = int_to_ptr.hbm [resolvable:$true] %s15_s11 }
   0x3   :  { %s17_s13 = sshll.u32 %s193_s12, 4  ;;  %s25_s16 = sshll.u32 %s223_s1, 4  ;;  %s18_s13 = int_to_ptr.vmem [resolvable:$true] %s17_s13  ;;  %s26_s16 = int_to_ptr.hbm [resolvable:$true] %s25_s16 }
   0x4   :  { %20 = dma.hbm_to_vmem [thread:$0]  %s16_s11, 128, %s18_s13, [#allocation4]  }
   0x5   :  { %s194_s17 = smov [#allocation6]   ;;  %s195_s19 = smov 128  }
   0x6   :  { %s27_s18 = sshll.u32 %s194_s17, 4  ;;  %s196_s20 = smov 8   ;;  %s28_s18 = int_to_ptr.vmem [resolvable:$true] %s27_s18 }
   0x7   :  { %33 = dma.hbm_to_vmem [thread:$0]  %s26_s16, 2048, %s28_s18, [#allocation7], %s195_s19, %s195_s19, %s196_s20  }
   0x8   :  { %187 = dma.done.wait [#allocation4], 128  }
   0x9   :  { %188 = vsyncadd [#allocation4], 4294967168 }
   0xa   :  { %189 = dma.done.wait [#allocation7], 2048  }
   0xb   :  { %190 = vsyncadd [#allocation7], 4294965248  ;;  %v64_v0 = vld [vmem:[#allocation6 + $0x78] sm:$0xff]  ;;  %v63_v1 = vld [vmem:[#allocation6 + $0x70] sm:$0xff]  ;;  %s197_s0 = smov [#allocation8]   ;;  %s99_s23 = sshll.u32 %s224_s2, 4  ;;  %s100_s23 = int_to_ptr.hbm [resolvable:$true] %s99_s23 }
   0xc   :  { %65 = vmatpush.msra.mxu0 %v64_v0  ;;  %v62_v2 = vld [vmem:[#allocation6 + $0x68] sm:$0xff]  ;;  %v61_v3 = vld [vmem:[#allocation6 + $0x60] sm:$0xff]  ;;  %v60_v4 = vld [vmem:[#allocation6 + $0x58] sm:$0xff]  ;;  %s97_s1 = sshll.u32 %s197_s0, 4  ;;  %s98_s1 = int_to_ptr.vmem [resolvable:$true] %s97_s1 }
   0xd   :  { %v59_v5 = vld [vmem:[#allocation6 + $0x50] sm:$0xff]  ;;  %v58_v6 = vld [vmem:[#allocation6 + $0x48] sm:$0xff]  ;;  %v57_v7 = vld [vmem:[#allocation6 + $0x40] sm:$0xff] }
   0xe   :  { %66 = vmatpush.msra.mxu0 %v63_v1  ;;  %v56_v8 = vld [vmem:[#allocation6 + $0x38] sm:$0xff]  ;;  %v55_v9 = vld [vmem:[#allocation6 + $0x30] sm:$0xff]  ;;  %v54_v10 = vld [vmem:[#allocation6 + $0x28] sm:$0xff] }
   0xf   :  { %v53_v11 = vld [vmem:[#allocation6 + $0x20] sm:$0xff]  ;;  %v52_v12 = vld [vmem:[#allocation6 + $0x18] sm:$0xff]  ;;  %v51_v13 = vld [vmem:[#allocation6 + $0x10] sm:$0xff] }
  0x10   :  { %67 = vmatpush.msra.mxu0 %v62_v2  ;;  %v50_v14 = vld [vmem:[#allocation6 + $0x8] sm:$0xff]  ;;  %v49_v15 = vld [vmem:[#allocation6] sm:$0xff]  ;;  %v48_v16 = vld [vmem:[#allocation3] sm:$0xff] }
  0x12   :  { %68 = vmatpush.msra.mxu0 %v61_v3 }
  0x14   :  { %69 = vmatpush.msra.mxu0 %v60_v4 }
  0x16   :  { %70 = vmatpush.msra.mxu0 %v59_v5 }
  0x18   :  { %71 = vmatpush.msra.mxu0 %v58_v6 }
  0x1a   :  { %72 = vmatpush.msra.mxu0 %v57_v7 }
  0x1c   :  { %73 = vmatpush.msra.mxu0 %v56_v8 }
  0x1e   :  { %74 = vmatpush.msra.mxu0 %v55_v9 }
  0x20   :  { %75 = vmatpush.msra.mxu0 %v54_v10 }
  0x22   :  { %76 = vmatpush.msra.mxu0 %v53_v11 }
  0x24   :  { %77 = vmatpush.msra.mxu0 %v52_v12 }
  0x26   :  { %78 = vmatpush.msra.mxu0 %v51_v13 }
  0x28   :  { %79 = vmatpush.msra.mxu0 %v50_v14 }
  0x2a   :  { %80 = vmatpush.msra.mxu0 %v49_v15 }
  0x2b   :  { %81 = vmatmul.f32.vlgmr.msra.gmra.mxu0 %v48_v16 }
  0xa8   :  { %v82_v17 = vpop.f32.mrf.mxu0 }
  0xa9   :  { %91 = vst [vmem:[#allocation8] sm:$0xff] %v82_v17 }
  0xaa   :  { %102 = dma.vmem_to_hbm [thread:$0]  %s98_s1, 128, %s100_s23, [#allocation5]  }
  0xab   :  { %191 = dma.done.wait [#allocation5], 128  }
  0xac   :  { %192 = vsyncadd [#allocation5], 4294967168 }
  0xad   :  { %107 = vsyncpa [#allocation4], 1 }
  0xae   :  { %108 = vsyncpa [#allocation7], 1 }
  0xaf   :  { %109 = vsyncpa [#allocation5], 1 }

</bundles_post_ra>
